<compile_context>
chip_gen: v5e
topology: v5e:2x2
jax: 0.10.0
libtpu: 0.0.40
codegen_flags: <defaults>
</compile_context>

<pallas_src>
import math
import numpy as np

import jax
import jax.numpy as jnp
from jax import lax
from jax.experimental import pallas as pl
from jax.experimental.pallas import tpu as pltpu


# -----------------------------------------------------------------------------
# Log-uniform (Zipfian) candidate sampler — external component in the original
# module (LogUniformSampler).  Implemented deterministically with numpy.
# TODO(synk): exact LogUniformSampler implementation is not part of the module
# source; this reproduces the standard TF-style log-uniform expected counts.
# -----------------------------------------------------------------------------
class LogUniformSampler:
    def __init__(self, ntokens):
        self.ntokens = ntokens
        self.log_n = math.log(ntokens + 1.0)

    def _prob(self, ids):
        ids = np.asarray(ids, dtype=np.float64)
        return (np.log(ids + 2.0) - np.log(ids + 1.0)) / self.log_n

    def sample(self, nsampled, labels, rng):
        sample_ids = []
        seen = set()
        num_tries = 0
        while len(sample_ids) < nsampled:
            x = rng.random()
            sid = int(math.exp(x * self.log_n)) - 1
            sid = min(max(sid, 0), self.ntokens - 1)
            num_tries += 1
            if sid not in seen:
                seen.add(sid)
                sample_ids.append(sid)
        sample_ids = np.asarray(sample_ids, dtype=np.int32)
        true_freq = -np.expm1(num_tries * np.log1p(-self._prob(labels)))
        sample_freq = -np.expm1(num_tries * np.log1p(-self._prob(sample_ids)))
        return sample_ids, true_freq.astype(np.float32), sample_freq.astype(np.float32)

    def accidental_match(self, labels, sample_ids):
        hits = []
        for i, lab in enumerate(labels):
            for j, sid in enumerate(sample_ids):
                if lab == sid:
                    hits.append((i, j))
        return hits


# -----------------------------------------------------------------------------
# Kernel helpers / tiling policy
# -----------------------------------------------------------------------------
# dot_general contracting on dim 1 of both operands: x[M,D] . w[N,D] -> [M,N]
_NT_DIMS = (((1,), (1,)), ((), ()))

# Tile caps (sublane/lane aligned).  With K-tiling the per-block footprint is
# tm*tk*2 + tn*tk*2 (+ small vectors) + tm*tn*4 scratch — a few MiB, which fits
# every generation's scoped VMEM.
_TM_CAP = 256        # batch rows per block (sampled / true kernels)
_TM_FULL_CAP = 512   # batch rows per block (full projection): large so the
                     # [V, D] weight is streamed from HBM only ceil(B/512) times
_TN_CAP = 512        # output columns per block
_TK_CAP = 512        # contraction (feature) chunk


def _blk_mn(n, cap):
    # Either the full dim (always legal) or an aligned cap (8/128 multiple).
    return n if n <= cap else cap


def _blk_k(d, cap):
    # K blocks must tile D exactly (edge padding would corrupt accumulation).
    if d <= cap:
        return d
    if d % cap == 0:
        return cap
    for t in range(cap, 127, -128):
        if d % t == 0:
            return t
    return d  # fallback: full-K block


def _vmem_limit_bytes(blocks, scratch_bytes=0):
    """Explicit scoped-VMEM budget from block sizes (inputs/outputs are
    double-buffered by the BlockSpec pipeline), with margin, clipped so it
    still fits v7x's 64 MiB physical VMEM."""
    total = scratch_bytes
    for shape, dtype in blocks:
        total += 2 * int(np.prod(shape)) * jnp.dtype(dtype).itemsize
    return int(min(max(2 * total + (4 << 20), 32 << 20), 48 << 20))


# -----------------------------------------------------------------------------
# Pallas kernels
# -----------------------------------------------------------------------------
def _sampled_logits_kernel(x_ref, sw_ref, sb_ref, lab_ref, sid_ref, lsf_ref,
                           out_ref, acc_ref):
    """Sampled logits: bf16 MXU matmul, K-tiled f32 accumulation, f32 epilogue
    (bias, accidental-match mask, log-frequency subtraction)."""
    k = pl.program_id(2)

    @pl.when(k == 0)
    def _():
        acc_ref[...] = jnp.zeros_like(acc_ref)

    acc_ref[...] += lax.dot_general(x_ref[...], sw_ref[...], _NT_DIMS,
                                    preferred_element_type=jnp.float32)

    @pl.when(k == pl.num_programs(2) - 1)
    def _():
        s = acc_ref[...] + sb_ref[...]                       # [tm,tn] + [1,tn]
        # remove accidental matches (sample id == true label) BEFORE the
        # log-frequency subtraction, matching the PyTorch order of operations.
        hit = lab_ref[...] == sid_ref[...]                   # [tm,1]==[1,tn]
        s = jnp.where(hit, jnp.float32(-1e37), s)
        out_ref[...] = s - lsf_ref[...]


def _true_logits_kernel(x_ref, tw_ref, tb_ref, ltf_ref, out_ref, acc_ref):
    """True logits: rowwise dot (VPU), K-tiled.  Multiply in bf16 and upcast
    only the product — no full-width f32 temporaries."""
    k = pl.program_id(1)

    @pl.when(k == 0)
    def _():
        acc_ref[...] = jnp.zeros_like(acc_ref)

    prod = (x_ref[...] * tw_ref[...]).astype(jnp.float32)    # [tm, tk]
    acc_ref[...] += jnp.sum(prod, axis=1, keepdims=True)     # [tm, 1]

    @pl.when(k == pl.num_programs(1) - 1)
    def _():
        out_ref[...] = acc_ref[...] + tb_ref[...] - ltf_ref[...]


def _full_linear_kernel(x_ref, w_ref, b_ref, out_ref, acc_ref):
    """Full projection: bf16 MXU matmul, K-tiled f32 accumulation."""
    k = pl.program_id(2)

    @pl.when(k == 0)
    def _():
        acc_ref[...] = jnp.zeros_like(acc_ref)

    acc_ref[...] += lax.dot_general(x_ref[...], w_ref[...], _NT_DIMS,
                                    preferred_element_type=jnp.float32)

    @pl.when(k == pl.num_programs(2) - 1)
    def _():
        out_ref[...] = acc_ref[...] + b_ref[...]


# -----------------------------------------------------------------------------
# pallas_call wrappers
# -----------------------------------------------------------------------------
def _sampled_pallas(x, sample_w, sample_b, labels2, sid2, lsf):
    B, D = x.shape
    S = sample_w.shape[0]
    tm = _blk_mn(B, _TM_CAP)
    tn = _blk_mn(S, _TN_CAP)
    tk = _blk_k(D, _TK_CAP)
    grid = (pl.cdiv(B, tm), pl.cdiv(S, tn), D // tk)

    vmem = _vmem_limit_bytes(
        [((tm, tk), jnp.bfloat16), ((tn, tk), jnp.bfloat16),
         ((1, tn), jnp.float32), ((tm, 1), jnp.int32), ((1, tn), jnp.int32),
         ((1, tn), jnp.float32), ((tm, tn), jnp.float32)],
        scratch_bytes=tm * tn * 4)

    return pl.pallas_call(
        _sampled_logits_kernel,
        out_shape=jax.ShapeDtypeStruct((B, S), jnp.float32),
        grid=grid,
        in_specs=[
            pl.BlockSpec((tm, tk), lambda i, j, k: (i, k)),   # x          (bf16)
            pl.BlockSpec((tn, tk), lambda i, j, k: (j, k)),   # W[samples] (bf16)
            pl.BlockSpec((1, tn), lambda i, j, k: (0, j)),    # b[samples] (f32)
            pl.BlockSpec((tm, 1), lambda i, j, k: (i, 0)),    # labels     (i32)
            pl.BlockSpec((1, tn), lambda i, j, k: (0, j)),    # sample ids (i32)
            pl.BlockSpec((1, tn), lambda i, j, k: (0, j)),    # log sample freq
        ],
        out_specs=pl.BlockSpec((tm, tn), lambda i, j, k: (i, j)),
        scratch_shapes=[pltpu.VMEM((tm, tn), jnp.float32)],
        # Both B and S axes are parallel (true-logit path lives in its own
        # kernel now); K is the reduction -> arbitrary.
        compiler_params=pltpu.CompilerParams(
            dimension_semantics=("parallel", "parallel", "arbitrary"),
            vmem_limit_bytes=vmem),
    )(x, sample_w, sample_b, labels2, sid2, lsf)


def _true_logits_pallas(x, true_w, true_b, ltf):
    B, D = x.shape
    tm = _blk_mn(B, _TM_CAP)
    tk = _blk_k(D, _TK_CAP)
    grid = (pl.cdiv(B, tm), D // tk)

    vmem = _vmem_limit_bytes(
        [((tm, tk), jnp.bfloat16), ((tm, tk), jnp.bfloat16),
         ((tm, 1), jnp.float32), ((tm, 1), jnp.float32), ((tm, 1), jnp.float32)],
        scratch_bytes=tm * 4)

    return pl.pallas_call(
        _true_logits_kernel,
        out_shape=jax.ShapeDtypeStruct((B, 1), jnp.float32),
        grid=grid,
        in_specs=[
            pl.BlockSpec((tm, tk), lambda i, k: (i, k)),      # x          (bf16)
            pl.BlockSpec((tm, tk), lambda i, k: (i, k)),      # W[labels]  (bf16)
            pl.BlockSpec((tm, 1), lambda i, k: (i, 0)),       # b[labels]  (f32)
            pl.BlockSpec((tm, 1), lambda i, k: (i, 0)),       # log true freq
        ],
        out_specs=pl.BlockSpec((tm, 1), lambda i, k: (i, 0)),
        scratch_shapes=[pltpu.VMEM((tm, 1), jnp.float32)],
        compiler_params=pltpu.CompilerParams(
            dimension_semantics=("parallel", "arbitrary"),
            vmem_limit_bytes=vmem),
    )(x, true_w, true_b, ltf)


def _full_pallas(x, w, b):
    # Tiled full projection.  tm covers up to 512 batch rows so the [V, D]
    # weight is streamed from HBM only ceil(B/512) times; the weight streams
    # in (tn, tk) blocks, double-buffered by the BlockSpec pipeline.
    B, D = x.shape
    V = w.shape[0]
    tm = _blk_mn(B, _TM_FULL_CAP)
    tn = _blk_mn(V, _TN_CAP)
    tk = _blk_k(D, _TK_CAP)
    grid = (pl.cdiv(B, tm), pl.cdiv(V, tn), D // tk)

    vmem = _vmem_limit_bytes(
        [((tm, tk), jnp.bfloat16), ((tn, tk), jnp.bfloat16),
         ((1, tn), jnp.float32), ((tm, tn), jnp.float32)],
        scratch_bytes=tm * tn * 4)

    return pl.pallas_call(
        _full_linear_kernel,
        out_shape=jax.ShapeDtypeStruct((B, V), jnp.float32),
        grid=grid,
        in_specs=[
            pl.BlockSpec((tm, tk), lambda i, j, k: (i, k)),   # x      (bf16)
            pl.BlockSpec((tn, tk), lambda i, j, k: (j, k)),   # weight (bf16)
            pl.BlockSpec((1, tn), lambda i, j, k: (0, j)),    # bias   (f32)
        ],
        out_specs=pl.BlockSpec((tm, tn), lambda i, j, k: (i, j)),
        scratch_shapes=[pltpu.VMEM((tm, tn), jnp.float32)],
        compiler_params=pltpu.CompilerParams(
            dimension_semantics=("parallel", "parallel", "arbitrary"),
            vmem_limit_bytes=vmem),
    )(x, w, b)


# -----------------------------------------------------------------------------
# Module wrapper
# -----------------------------------------------------------------------------
class SampledSoftmax:
    def __init__(self, ntokens, nsampled, nhid, tied_weight=None, *, key):
        self.ntokens = ntokens
        self.nsampled = nsampled
        self.nhid = nhid
        self.sampler = LogUniformSampler(ntokens)
        self.training = True

        kw, kb = jax.random.split(key)
        if tied_weight is not None:
            self.weight = tied_weight                                  # [ntokens, nhid]
        else:
            stdv = math.sqrt(3.0 / (ntokens + nhid))
            self.weight = jax.random.uniform(
                kw, (ntokens, nhid), jnp.float32, minval=-stdv, maxval=stdv)
        bound = 1.0 / math.sqrt(nhid)                                  # nn.Linear bias init
        self.bias = jax.random.uniform(
            kb, (ntokens,), jnp.float32, minval=-bound, maxval=bound)

        # Persistent bf16 copy — avoids a full [V, D] f32->bf16 HBM pass on
        # every eval call; sampled-path gathers also read this directly.
        # TODO(synk): refresh weight_bf16 whenever the (possibly tied) f32
        # weight is updated by the optimizer.
        self.weight_bf16 = self.weight.astype(jnp.bfloat16)
        self.bias_row = self.bias.reshape(1, -1)

    def __call__(self, inputs, labels, *, np_rng):
        if self.training:
            labels_np = np.asarray(labels)
            sample_values = self.sampler.sample(self.nsampled, labels_np, np_rng)
            logits = self.sampled(inputs, labels, sample_values)
            new_targets = jnp.zeros((inputs.shape[0],), dtype=jnp.int32)
            return logits, new_targets
        else:
            return self.full(inputs)

    def sampled(self, inputs, labels, sample_values):
        B = inputs.shape[0]
        sample_ids_np, true_freq_np, sample_freq_np = sample_values
        sample_ids = jnp.asarray(sample_ids_np, dtype=jnp.int32)       # [S]
        true_freq = jnp.asarray(true_freq_np, dtype=jnp.float32)       # [B]
        sample_freq = jnp.asarray(sample_freq_np, dtype=jnp.float32)   # [S]

        labels = labels.astype(jnp.int32)
        x_bf = inputs.astype(jnp.bfloat16)                             # [B, D]
        # Row gathers stay in plain JAX, reading the persistent bf16 weight
        # (no full-matrix cast per step).
        # TODO(synk): fuse gathers into the kernel via PrefetchScalarGridSpec
        # scalar-prefetched ids to remove this HBM materialization.
        true_w = jnp.take(self.weight_bf16, labels, axis=0)            # [B, D]
        true_b = jnp.take(self.bias, labels, axis=0).reshape(B, 1)     # [B, 1]
        sample_w = jnp.take(self.weight_bf16, sample_ids, axis=0)      # [S, D]
        sample_b = jnp.take(self.bias, sample_ids, axis=0).reshape(1, -1)  # [1, S]

        lab2 = labels.reshape(B, 1)                                    # [B, 1]
        sid2 = sample_ids.reshape(1, -1)                               # [1, S]
        # clamp before log so an underflowed frequency can't produce -inf
        ltf = jnp.log(jnp.maximum(true_freq, 1e-30)).reshape(B, 1)     # [B, 1]
        lsf = jnp.log(jnp.maximum(sample_freq, 1e-30)).reshape(1, -1)  # [1, S]

        true_logits = _true_logits_pallas(x_bf, true_w, true_b, ltf)   # [B, 1]
        samp_logits = _sampled_pallas(x_bf, sample_w, sample_b,
                                      lab2, sid2, lsf)                 # [B, S]
        # TODO(synk): return the two arrays separately to the loss to skip this
        # extra [B, 1+S] HBM read+write pass.
        return jnp.concatenate([true_logits, samp_logits], axis=1)

    def full(self, inputs):
        return _full_pallas(inputs.astype(jnp.bfloat16),
                            self.weight_bf16, self.bias_row)


# -----------------------------------------------------------------------------
# Pure-JAX references (same bf16 operand policy) for a loose correctness check
# -----------------------------------------------------------------------------
def _ref_sampled(x, weight, bias, labels, sample_ids, true_freq, sample_freq):
    xb = x.astype(jnp.bfloat16)
    tw = jnp.take(weight, labels, axis=0).astype(jnp.bfloat16)
    tb = jnp.take(bias, labels, axis=0)
    sw = jnp.take(weight, sample_ids, axis=0).astype(jnp.bfloat16)
    sb = jnp.take(bias, sample_ids, axis=0)
    t = jnp.sum(xb.astype(jnp.float32) * tw.astype(jnp.float32), axis=1) + tb
    s = lax.dot_general(xb, sw, _NT_DIMS, preferred_element_type=jnp.float32) + sb[None, :]
    hit = labels[:, None] == sample_ids[None, :]
    s = jnp.where(hit, jnp.float32(-1e37), s)
    t = t - jnp.log(jnp.maximum(true_freq, 1e-30))
    s = s - jnp.log(jnp.maximum(sample_freq, 1e-30))[None, :]
    return jnp.concatenate([t[:, None], s], axis=1)


def _ref_full(x, weight, bias):
    return lax.dot_general(x.astype(jnp.bfloat16), weight.astype(jnp.bfloat16),
                           _NT_DIMS, preferred_element_type=jnp.float32) + bias[None, :]


# -----------------------------------------------------------------------------
if __name__ == "__main__":
    ntokens, nsampled, nhid, batch = 50, 16, 32, 8

    key = jax.random.PRNGKey(0)
    k_mod, k_x, k_lab = jax.random.split(key, 3)

    model = SampledSoftmax(ntokens, nsampled, nhid, tied_weight=None, key=k_mod)

    x = jax.random.normal(k_x, (batch, nhid), dtype=jnp.float32)
    labels = jax.random.randint(k_lab, (batch,), 0, ntokens, dtype=jnp.int32)

    np_rng = np.random.default_rng(0)

    # --- training path (sampled softmax) ---
    model.training = True
    labels_np = np.asarray(labels)
    sample_values = model.sampler.sample(nsampled, labels_np, np_rng)
    logits = model.sampled(x, labels, sample_values)
    new_targets = jnp.zeros((batch,), dtype=jnp.int32)
    logits = jax.block_until_ready(logits)
    assert logits.shape == (batch, 1 + nsampled)
    assert new_targets.shape == (batch,)

    sid_np, tf_np, sf_np = sample_values
    ref = _ref_sampled(x, model.weight, model.bias, labels,
                       jnp.asarray(sid_np, jnp.int32),
                       jnp.asarray(tf_np, jnp.float32),
                       jnp.asarray(sf_np, jnp.float32))
    np.testing.assert_allclose(np.asarray(logits), np.asarray(ref),
                               rtol=5e-2, atol=5e-2)

    # --- eval path (full projection) ---
    model.training = False
    full_logits = jax.block_until_ready(model(x, labels, np_rng=np_rng))
    assert full_logits.shape == (batch, ntokens)
    ref_full = _ref_full(x, model.weight, model.bias)
    np.testing.assert_allclose(np.asarray(full_logits), np.asarray(ref_full),
                               rtol=5e-2, atol=5e-2)

    print("KERNEL_OK")
</pallas_src>

<mosaic_0001>
module attributes {stable_mosaic.version = 11 : i64} {
  func.func @_true_logits_kernel(%arg0: i32, %arg1: i32, %arg2: memref<8x32xbf16, #tpu.memory_space<vmem>>, %arg3: memref<8x32xbf16, #tpu.memory_space<vmem>>, %arg4: memref<8x1xf32, #tpu.memory_space<vmem>>, %arg5: memref<8x1xf32, #tpu.memory_space<vmem>>, %arg6: memref<8x1xf32, #tpu.memory_space<vmem>>, %arg7: memref<8x1xf32, #tpu.memory_space<vmem>>) attributes {dimension_semantics = [#tpu.dimension_semantics<parallel>, #tpu.dimension_semantics<arbitrary>], iteration_bounds = array<i64: 1, 1>, scalar_prefetch = 0 : i64, scratch_operands = 1 : i64, tpu.core_type = #tpu.core_type<tc>, window_params = [{transform_indices = @transform_0, window_bounds = array<i64: 8, 32>}, {transform_indices = @transform_1, window_bounds = array<i64: 8, 32>}, {transform_indices = @transform_2, window_bounds = array<i64: 8, 1>}, {transform_indices = @transform_3, window_bounds = array<i64: 8, 1>}, {transform_indices = @transform_4, window_bounds = array<i64: 8, 1>}]} {
    %c0_i32 = arith.constant 0 : i32
    %0 = arith.cmpi eq, %arg1, %c0_i32 : i32
    %1 = arith.extui %0 : i1 to i32
    %c0_i32_0 = arith.constant 0 : i32
    %2 = arith.cmpi ne, %1, %c0_i32_0 : i32
    scf.if %2 {
      %cst_10 = arith.constant 0.000000e+00 : f32
      %15 = vector.broadcast %cst_10 : f32 to vector<8x1xf32>
      %c0_11 = arith.constant 0 : index
      %c0_12 = arith.constant 0 : index
      %16 = vector.load %arg7[%c0_11, %c0_12] : memref<8x1xf32, #tpu.memory_space<vmem>>, vector<8x1xf32>
      tpu.vector_store %arg7[%c0_11, %c0_12], %15 {strides = array<i32>} : memref<8x1xf32, #tpu.memory_space<vmem>>, vector<8x1xf32>,
    } else {
    }
    %c0 = arith.constant 0 : index
    %c0_1 = arith.constant 0 : index
    %3 = vector.load %arg2[%c0, %c0_1] : memref<8x32xbf16, #tpu.memory_space<vmem>>, vector<8x32xbf16>
    %c0_2 = arith.constant 0 : index
    %c0_3 = arith.constant 0 : index
    %4 = vector.load %arg3[%c0_2, %c0_3] : memref<8x32xbf16, #tpu.memory_space<vmem>>, vector<8x32xbf16>
    %5 = arith.mulf %3, %4 : vector<8x32xbf16>
    %6 = arith.extf %5 : vector<8x32xbf16> to vector<8x32xf32>
    %c0_4 = arith.constant 0 : index
    %c0_5 = arith.constant 0 : index
    %7 = vector.load %arg7[%c0_4, %c0_5] : memref<8x1xf32, #tpu.memory_space<vmem>>, vector<8x1xf32>
    %cst = arith.constant dense<0.000000e+00> : vector<8xf32>
    %8 = vector.multi_reduction <add>, %6, %cst [1] : vector<8x32xf32> to vector<8xf32>
    %9 = vector.shape_cast %8 : vector<8xf32> to vector<8x1xf32>
    %10 = arith.addf %7, %9 : vector<8x1xf32>
    %c0_6 = arith.constant 0 : index
    %c0_7 = arith.constant 0 : index
    %11 = vector.load %arg7[%c0_6, %c0_7] : memref<8x1xf32, #tpu.memory_space<vmem>>, vector<8x1xf32>
    tpu.vector_store %arg7[%c0_6, %c0_7], %10 {strides = array<i32>} : memref<8x1xf32, #tpu.memory_space<vmem>>, vector<8x1xf32>,
    %c0_i32_8 = arith.constant 0 : i32
    %12 = arith.cmpi eq, %arg1, %c0_i32_8 : i32
    %13 = arith.extui %12 : i1 to i32
    %c0_i32_9 = arith.constant 0 : i32
    %14 = arith.cmpi ne, %13, %c0_i32_9 : i32
    scf.if %14 {
      %c0_10 = arith.constant 0 : index
      %c0_11 = arith.constant 0 : index
      %15 = vector.load %arg7[%c0_10, %c0_11] : memref<8x1xf32, #tpu.memory_space<vmem>>, vector<8x1xf32>
      %c0_12 = arith.constant 0 : index
      %c0_13 = arith.constant 0 : index
      %16 = vector.load %arg4[%c0_12, %c0_13] : memref<8x1xf32, #tpu.memory_space<vmem>>, vector<8x1xf32>
      %17 = arith.addf %15, %16 : vector<8x1xf32>
      %c0_14 = arith.constant 0 : index
      %c0_15 = arith.constant 0 : index
      %18 = vector.load %arg5[%c0_14, %c0_15] : memref<8x1xf32, #tpu.memory_space<vmem>>, vector<8x1xf32>
      %19 = arith.subf %17, %18 : vector<8x1xf32>
      %c0_16 = arith.constant 0 : index
      %c0_17 = arith.constant 0 : index
      %20 = vector.load %arg6[%c0_16, %c0_17] : memref<8x1xf32, #tpu.memory_space<vmem>>, vector<8x1xf32>
      tpu.vector_store %arg6[%c0_16, %c0_17], %19 {strides = array<i32>} : memref<8x1xf32, #tpu.memory_space<vmem>>, vector<8x1xf32>,
    } else {
    }
    return
  }
  func.func @transform_0(%arg0: i32, %arg1: i32) -> (i32, i32) {
    %c0_i32 = arith.constant 0 : i32
    return %arg0, %arg1 : i32, i32
  }
  func.func @transform_1(%arg0: i32, %arg1: i32) -> (i32, i32) {
    %c0_i32 = arith.constant 0 : i32
    return %arg0, %arg1 : i32, i32
  }
  func.func @transform_2(%arg0: i32, %arg1: i32) -> (i32, i32) {
    %c0_i32 = arith.constant 0 : i32
    %c0_i32_0 = arith.constant 0 : i32
    return %arg0, %c0_i32 : i32, i32
  }
  func.func @transform_3(%arg0: i32, %arg1: i32) -> (i32, i32) {
    %c0_i32 = arith.constant 0 : i32
    %c0_i32_0 = arith.constant 0 : i32
    return %arg0, %c0_i32 : i32, i32
  }
  func.func @transform_4(%arg0: i32, %arg1: i32) -> (i32, i32) {
    %c0_i32 = arith.constant 0 : i32
    %c0_i32_0 = arith.constant 0 : i32
    return %arg0, %c0_i32 : i32, i32
  }
}

</mosaic_0001>

<bundles_post_ra>
// kernel: tpu_custom_call.1
= control target key start
LH: loop header
LB: loop body
LE: loop exit
PB: predicated region body
PF: predicated region fallthrough
CT: control target
= control target key end

     0   :  { %vm21_vm0 = vcmask 7168   ;;  %v52_v2 = vmov 0.0   ;;  %vm31_vm1 = vcmask 261120   ;;  %s96_s0 = inlined_call_operand.vmem [shape: bf16[8,32], index: 0, kind: input, shape index: {}]   ;;  %s97_s1 = inlined_call_operand.vmem [shape: bf16[8,32], index: 1, kind: input, shape index: {}]   ;;  %s98_s2 = inlined_call_operand.vmem [shape: f32[8,1], index: 2, kind: input, shape index: {}]   ;;  %s99_s3 = inlined_call_operand.vmem [shape: f32[8,1], index: 3, kind: input, shape index: {}]   ;;  %s100_s4 = inlined_call_operand.vmem [shape: f32[8,1], index: 4, kind: output, shape index: {}]  }
   0x1   :  { %v23_v0 = vld [vmem:[%s96_s0] sm:$0xf]  ;;  %22 = vst.msk [vmem:[#allocation2] sm:$0xff] %vm21_vm0, %v52_v2 }
   0x2   :  { %v24_v1 = vld [vmem:[%s97_s1] sm:$0xf]  ;;  %v25_v3 = vunpack.c.l.bf16 %v23_v0 }
   0x3   :  { %v26_v4 = vunpack.c.l.bf16 %v24_v1  ;;  %v42_v12 = vld [vmem:[%s98_s2] sm:$0xff] }
   0x4   :  { %v44_v14 = vld [vmem:[%s99_s3] sm:$0xff] }
   0x5   :  { %v27_v5 = vmul.f32 %v26_v4, %v25_v3 }
   0x7   :  { %v28_v6 = vpack.c.bf16 %v27_v5, %v27_v5 }
   0x8   :  { %v30_v9 = vld [vmem:[#allocation2] sm:$0xff] }
   0x9   :  { %v29_v7 = vunpack.c.l.bf16 %v28_v6 }
   0xb   :  { %v32_v8 = vsel %vm31_vm1, %v29_v7, 0.0 }
   0xc   :  { %33 = vadd.xlane.f32.xlu0 %v32_v8 }
  0x7f   :  { %v34_v10 = vpop.xlane.xlu0 %33 }
  0x80   :  { %v35_v11 = vadd.f32 %v34_v10, %v30_v9 }
  0x82   :  { %37 = vst.msk [vmem:[#allocation2] sm:$0xff] %vm21_vm0, %v35_v11 }
  0x89   :  { %v41_v13 = vld [vmem:[#allocation2] sm:$0xff] }
  0x8a   :  { %v43_v15 = vadd.f32 %v42_v12, %v41_v13 }
  0x8c   :  { %v45_v16 = vsub.f32 %v43_v15, %v44_v14 }
  0x8e   :  { %46 = vst.msk [vmem:[%s100_s4] sm:$0xff] %vm21_vm0, %v45_v16 }

</bundles_post_ra>
